<compile_context>
chip_gen: v7x
topology: tpu7x:2x2x1
jax: 0.10.0
libtpu: 0.0.40
codegen_flags: <defaults>
</compile_context>

<pallas_src>
import functools

import jax
import jax.numpy as jnp
from jax.experimental import pallas as pl
from jax.experimental.pallas import tpu as pltpu


def _focal_rowwise_kernel(x_ref, t_ref, o_ref, *, gamma):
    """Layout [rows, C]: classes on the lane axis (use when C >= 128)."""
    x = x_ref[...].astype(jnp.float32)                 # (tile, C)
    t = t_ref[...]                                     # (tile, 1) int32

    # Numerically stable logsumexp along the class (lane) axis.
    m = jnp.max(x, axis=1, keepdims=True)
    lse = m + jnp.log(jnp.sum(jnp.exp(x - m), axis=1, keepdims=True))

    # Gather x[n, target[n]] with a one-hot lane mask, THEN do the focal
    # transform on the (tile, 1) column only.
    onehot = jax.lax.broadcasted_iota(jnp.int32, x.shape, 1) == t
    x_t = jnp.sum(jnp.where(onehot, x, 0.0), axis=1, keepdims=True)
    logpt = x_t - lse                                  # (tile, 1)
    pt = jnp.exp(logpt)
    o_ref[...] = -((1.0 - pt) ** gamma) * logpt        # per-sample focal NLL


def _focal_colwise_kernel(xt_ref, t_ref, o_ref, *, gamma):
    """Transposed layout [C, cols]: samples on the lane axis (use when C < 128)."""
    x = xt_ref[...].astype(jnp.float32)                # (C, tile)
    t = t_ref[...]                                     # (1, tile) int32

    m = jnp.max(x, axis=0, keepdims=True)
    lse = m + jnp.log(jnp.sum(jnp.exp(x - m), axis=0, keepdims=True))

    onehot = jax.lax.broadcasted_iota(jnp.int32, x.shape, 0) == t
    x_t = jnp.sum(jnp.where(onehot, x, 0.0), axis=0, keepdims=True)
    logpt = x_t - lse                                  # (1, tile)
    pt = jnp.exp(logpt)
    o_ref[...] = -((1.0 - pt) ** gamma) * logpt        # per-sample focal NLL


def _round_up(v, m):
    return ((v + m - 1) // m) * m


def focal_loss(x, target, gamma=2, weight=None, tile_samples=None):
    """x: [N, C] float, target: [N] int. Returns scalar float32 focal loss."""
    if weight is not None:
        # TODO(synk): per-class `weight` (weighted-mean nll) not implemented;
        # the module's default (weight=None) is what is reproduced here.
        raise NotImplementedError("per-class weight is not supported")
    n, c = x.shape
    gamma = int(gamma)
    target = target.astype(jnp.int32)
    itemsize = jnp.dtype(x.dtype).itemsize

    # Per input buffer budget; the x tile is double-buffered -> <= 12 MiB,
    # comfortably inside the 32 MiB scoped VMEM requested below on every
    # generation (v7x has only 64 MiB physical VMEM, v5e/v6e have 128 MiB).
    budget = 6 * 1024 * 1024
    compiler_params = pltpu.CompilerParams(
        # Disjoint output blocks: safe to parallelize; on v7x the two
        # TensorCores split this axis (sequential loop on v5e/v6e).
        dimension_semantics=("parallel",),
        vmem_limit_bytes=32 * 1024 * 1024,
    )

    if c < 128:
        # Lane-dense layout for small C: classes on sublanes, samples on lanes.
        xt = x.T                                   # small-C data: cheap one-off copy
        t2 = target.reshape(1, n)
        tile = tile_samples if tile_samples is not None else min(
            budget // (c * itemsize), 4096)
        if n <= tile:
            tile = n                               # single block (block dim == array dim)
        else:
            tile = max(128, (tile // 128) * 128)   # lane-axis blocks: multiple of 128
        per_sample = pl.pallas_call(
            functools.partial(_focal_colwise_kernel, gamma=gamma),
            out_shape=jax.ShapeDtypeStruct((1, n), jnp.float32),
            grid=(pl.cdiv(n, tile),),
            in_specs=[
                pl.BlockSpec((c, tile), lambda i: (0, i)),
                pl.BlockSpec((1, tile), lambda i: (0, i)),
            ],
            out_specs=pl.BlockSpec((1, tile), lambda i: (0, i)),
            compiler_params=compiler_params,
        )(xt, t2)
        picked = per_sample[0, :]
    else:
        t2 = target.reshape(n, 1)
        if tile_samples is not None:
            tile = tile_samples
        else:
            tile = max(8, min(budget // (c * itemsize), 1024))
            tile = (tile // 8) * 8                 # sublane-axis blocks: multiple of 8
        tile = min(tile, _round_up(n, 8))
        per_sample = pl.pallas_call(
            functools.partial(_focal_rowwise_kernel, gamma=gamma),
            out_shape=jax.ShapeDtypeStruct((n, 1), jnp.float32),
            grid=(pl.cdiv(n, tile),),
            in_specs=[
                pl.BlockSpec((tile, c), lambda i: (i, 0)),
                pl.BlockSpec((tile, 1), lambda i: (i, 0)),
            ],
            out_specs=pl.BlockSpec((tile, 1), lambda i: (i, 0)),
            compiler_params=compiler_params,
        )(x, t2)
        picked = per_sample[:, 0]

    # weight=None => plain mean over N samples (nll_loss default reduction).
    return jnp.mean(picked)


def _focal_loss_ref(x, target, gamma=2):
    logpt = jax.nn.log_softmax(x.astype(jnp.float32), axis=1)
    pt = jnp.exp(logpt)
    focal = ((1.0 - pt) ** gamma) * logpt
    picked = jnp.take_along_axis(focal, target[:, None].astype(jnp.int32), axis=1)[:, 0]
    return -jnp.mean(picked)


if __name__ == "__main__":
    key = jax.random.PRNGKey(0)

    def check(n, c, tile=None):
        kx, kt = jax.random.split(jax.random.fold_in(key, n * 1009 + c))
        x = jax.random.normal(kx, (n, c), dtype=jnp.float32)
        t = jax.random.randint(kt, (n,), 0, c, dtype=jnp.int32)
        got = focal_loss(x, t, gamma=2, tile_samples=tile)
        jax.block_until_ready(got)
        ref = _focal_loss_ref(x, t, gamma=2)
        assert jnp.allclose(got, ref, atol=1e-5, rtol=1e-4), (n, c, got, ref)

    check(16, 10)               # small-C lane-dense path, single block
    check(300, 10, tile=128)    # small-C path, multi-block grid + ragged tail
    check(37, 160, tile=16)     # C>=128 row-tiled path, ragged tail block
    print("KERNEL_OK")
</pallas_src>

<mosaic_0001>
module attributes {stable_mosaic.version = 11 : i64} {
  func.func @_focal_colwise_kernel(%arg0: i32, %arg1: memref<10x16xf32, #tpu.memory_space<vmem>>, %arg2: memref<1x16xi32, #tpu.memory_space<vmem>>, %arg3: memref<1x16xf32, #tpu.memory_space<vmem>>) attributes {dimension_semantics = [#tpu.dimension_semantics<parallel>], iteration_bounds = array<i64: 1>, scalar_prefetch = 0 : i64, scratch_operands = 0 : i64, tpu.core_type = #tpu.core_type<tc>, window_params = [{transform_indices = @transform_0, window_bounds = array<i64: 10, 16>}, {transform_indices = @transform_1, window_bounds = array<i64: 1, 16>}, {transform_indices = @transform_2, window_bounds = array<i64: 1, 16>}]} {
    %c0 = arith.constant 0 : index
    %c0_0 = arith.constant 0 : index
    %0 = vector.load %arg1[%c0, %c0_0] : memref<10x16xf32, #tpu.memory_space<vmem>>, vector<10x16xf32>
    %c0_1 = arith.constant 0 : index
    %c0_2 = arith.constant 0 : index
    %1 = vector.load %arg2[%c0_1, %c0_2] : memref<1x16xi32, #tpu.memory_space<vmem>>, vector<1x16xi32>
    %cst = arith.constant dense<0xFF800000> : vector<16xf32>
    %2 = vector.multi_reduction <maximumf>, %0, %cst [0] : vector<10x16xf32> to vector<16xf32>
    %3 = vector.shape_cast %2 : vector<16xf32> to vector<1x16xf32>
    %4 = vector.broadcast %3 : vector<1x16xf32> to vector<10x16xf32>
    %5 = arith.subf %0, %4 : vector<10x16xf32>
    %6 = math.exp %5 : vector<10x16xf32>
    %cst_3 = arith.constant dense<0.000000e+00> : vector<16xf32>
    %7 = vector.multi_reduction <add>, %6, %cst_3 [0] : vector<10x16xf32> to vector<16xf32>
    %8 = vector.shape_cast %7 : vector<16xf32> to vector<1x16xf32>
    %9 = math.log %8 : vector<1x16xf32>
    %10 = arith.addf %3, %9 : vector<1x16xf32>
    %11 = tpu.iota {dimensions = array<i32: 0>} : vector<10x16xi32>
    %12 = vector.broadcast %1 : vector<1x16xi32> to vector<10x16xi32>
    %13 = arith.cmpi eq, %11, %12 : vector<10x16xi32>
    %cst_4 = arith.constant 0.000000e+00 : f32
    %14 = vector.broadcast %cst_4 : f32 to vector<10x16xf32>
    %15 = arith.select %13, %0, %14 : vector<10x16xi1>, vector<10x16xf32>
    %cst_5 = arith.constant dense<0.000000e+00> : vector<16xf32>
    %16 = vector.multi_reduction <add>, %15, %cst_5 [0] : vector<10x16xf32> to vector<16xf32>
    %17 = vector.shape_cast %16 : vector<16xf32> to vector<1x16xf32>
    %18 = arith.subf %17, %10 : vector<1x16xf32>
    %19 = math.exp %18 : vector<1x16xf32>
    %cst_6 = arith.constant 1.000000e+00 : f32
    %20 = vector.broadcast %cst_6 : f32 to vector<1x16xf32>
    %21 = arith.subf %20, %19 : vector<1x16xf32>
    %22 = arith.mulf %21, %21 : vector<1x16xf32>
    %cst_7 = arith.constant 0.000000e+00 : f32
    %23 = vector.broadcast %cst_7 : f32 to vector<1x16xf32>
    %24 = arith.subf %23, %22 : vector<1x16xf32>
    %25 = arith.mulf %24, %18 : vector<1x16xf32>
    %c0_8 = arith.constant 0 : index
    %c0_9 = arith.constant 0 : index
    %26 = vector.load %arg3[%c0_8, %c0_9] : memref<1x16xf32, #tpu.memory_space<vmem>>, vector<1x16xf32>
    tpu.vector_store %arg3[%c0_8, %c0_9], %25 {strides = array<i32>} : memref<1x16xf32, #tpu.memory_space<vmem>>, vector<1x16xf32>,
    return
  }
  func.func @transform_0(%arg0: i32) -> (i32, i32) {
    %c0_i32 = arith.constant 0 : i32
    %c0_i32_0 = arith.constant 0 : i32
    return %c0_i32, %arg0 : i32, i32
  }
  func.func @transform_1(%arg0: i32) -> (i32, i32) {
    %c0_i32 = arith.constant 0 : i32
    %c0_i32_0 = arith.constant 0 : i32
    return %c0_i32, %arg0 : i32, i32
  }
  func.func @transform_2(%arg0: i32) -> (i32, i32) {
    %c0_i32 = arith.constant 0 : i32
    %c0_i32_0 = arith.constant 0 : i32
    return %c0_i32, %arg0 : i32, i32
  }
}

</mosaic_0001>

<bundles_post_ra>
// kernel: tpu_custom_call.1
= control target key start
LH: loop header
LB: loop body
LE: loop exit
PB: predicated region body
PF: predicated region fallthrough
CT: control target
= control target key end

     0   :  { %7 = vsyncpa [#allocation3], 0  ;;  %s215_s0 = inlined_call_operand.hbm [shape: f32[10,16], index: 0, kind: input, shape index: {}]   ;;  %s216_s1 = inlined_call_operand.vmem [shape: s32[1,16], index: 1, kind: input, shape index: {}]   ;;  %s217_s2 = inlined_call_operand.hbm [shape: f32[1,16], index: 2, kind: output, shape index: {}]  }
   0x1   :  { %8 = vsyncpa [#allocation4], 0  ;;  %s163_s9 = smov [#allocation2]   ;;  %s115_s13 = scalar_lea.hbm %s215_s0, 256 }
   0x2   :  { %s14_s10 = sshll.u32 %s163_s9, 4  ;;  %p116_p0 = scmp.ne.s32.totalorder %s215_s0, %s115_s13  ;;  %s15_s10 = int_to_ptr.vmem [resolvable:$true] %s14_s10 }
   0x3   :  { %p119_p1 = scmp.lt.u32.totalorder %s115_s13, %s215_s0 }
   0x5   :  { %p121_p2 = pnand %p119_p1, %p116_p0 }
   0x7   :  { %124 = shalt.err (!%p121_p2)
}
   0x8   :  { %s125_s18 = scalar_lea.vmem %s15_s10, 256  ;;  %p130_p4 = scmp.lt.s32.totalorder %s15_s10, %s15_s10 }
   0x9   :  { %p126_p3 = scmp.ne.s32.totalorder %s15_s10, %s125_s18  ;;  %p131_p5 = scmp.lt.s32.totalorder %s125_s18, %s125_s18 }
   0xb   :  { %p132_p6 = por %p131_p5, %p130_p4 }
   0xd   :  { %p133_p7 = pnand %p132_p6, %p126_p3 }
   0xf   :  { %136 = shalt.err (!%p133_p7)
}
  0x10   :  { %s164_s19 = smov 128   ;;  %s165_s20 = smov 8  }
  0x11   :  { %20 = dma.hbm_to_vmem [thread:$0]  %s215_s0, 256, %s15_s10, [#allocation3], %s164_s19, %s164_s19, %s165_s20  }
  0x12   :  { %159 = dma.done.wait [#allocation3], 256  }
  0x13   :  { %160 = vsyncadd [#allocation3], 4294967040  ;;  %vm29_vm0 = vcmask 130048   ;;  %vm31_vm1 = vcmask 123904   ;;  %v26_v0 = vld [vmem:[#allocation2] sm:$0xff]  ;;  %v58_v10 = vlaneseq  ;;  %vm85_vm4 = vcmask 122880  }
  0x14   :  { %v27_v1 = vld [vmem:[#allocation2 + $0x8] sm:$0x3]  ;;  %v30_v2 = vsel %vm29_vm0, %v26_v0, -inf  ;;  %v102_v18 = vld [vmem:[%s216_s1] ss:$0 sm:$0xff]  ;;  %s166_s1 = smov [#allocation5]  }
  0x15   :  { %v32_v3 = vsel %vm31_vm1, %v27_v1, -inf  ;;  %v59_v14 = vshrl.u32 %v58_v10, 7  ;;  %s93_s24 = sshll.u32 %s166_s1, 4  ;;  %s94_s24 = int_to_ptr.vmem [resolvable:$true] %s93_s24 }
  0x16   :  { %v33_v4 = vmax.f32 %v30_v2, %v32_v3  ;;  %s137_s25 = scalar_lea.vmem %s94_s24, 16  ;;  %s141_s26 = scalar_lea.vmem %s94_s24, 32 }
  0x17   :  { %v60_v17 = vadd.s32 8, %v59_v14  ;;  %vm65_vm2 = vcmp.eq.s32.totalorder %v59_v14, %v102_v18  ;;  %p138_p8 = scmp.ne.s32.totalorder %s94_s24, %s137_s25  ;;  %p142_p9 = scmp.lt.s32.totalorder %s94_s24, %s94_s24 }
  0x18   :  { %v34_v5 = vrot.slane %v33_v4, 4  ;;  %v67_v19 = vsel %vm65_vm2, %v26_v0, 0.0  ;;  %p143_p10 = scmp.lt.s32.totalorder %s141_s26, %s137_s25 }
  0x19   :  { %vm66_vm3 = vcmp.eq.s32.totalorder %v60_v17, %v102_v18  ;;  %v69_v24 = vsel %vm29_vm0, %v67_v19, 0.0 }
  0x1a   :  { %v35_v6 = vmax.f32 %v33_v4, %v34_v5  ;;  %v68_v20 = vsel %vm66_vm3, %v27_v1, 0.0  ;;  %p144_p11 = por %p143_p10, %p142_p9 }
  0x1b   :  { %v70_v25 = vsel %vm31_vm1, %v68_v20, 0.0 }
  0x1c   :  { %v36_v7 = vrot.slane %v35_v6, 2  ;;  %v71_v28 = vadd.f32 %v70_v25, %v69_v24  ;;  %p145_p12 = pnand %p144_p11, %p138_p8 }
  0x1e   :  { %v37_v8 = vmax.f32 %v35_v6, %v36_v7  ;;  %v72_v31 = vrot.slane %v71_v28, 4 }
  0x20   :  { %v38_v9 = vrot.slane %v37_v8, 1  ;;  %v73_v34 = vadd.f32 %v72_v31, %v71_v28 }
  0x22   :  { %v39_v11 = vmax.f32 %v37_v8, %v38_v9  ;;  %v74_v37 = vrot.slane %v73_v34, 2 }
  0x24   :  { %v40_v12 = vsub.f32 %v26_v0, %v39_v11  ;;  %v41_v13 = vsub.f32 %v27_v1, %v39_v11  ;;  %v75_v38 = vadd.f32 %v74_v37, %v73_v34 }
  0x26   :  { %v42_v15 = vmul.f32 1.442695, %v40_v12  ;;  %v44_v16 = vmul.f32 1.442695, %v41_v13  ;;  %v76_v39 = vrot.slane %v75_v38, 1 }
  0x28   :  { %107 = vpow2.f32 %v42_v15  ;;  %v77_v42 = vadd.f32 %v76_v39, %v75_v38 }
  0x29   :  { %109 = vpow2.f32 %v44_v16 }
  0x32   :  { %v108_v21 = vpop.eup %107 }
  0x33   :  { %v110_v22 = vpop.eup %109  ;;  %v46_v23 = vsel %vm29_vm0, %v108_v21, 0.0 }
  0x34   :  { %v47_v26 = vsel %vm31_vm1, %v110_v22, 0.0 }
  0x35   :  { %v48_v27 = vadd.f32 %v47_v26, %v46_v23 }
  0x37   :  { %v49_v29 = vrot.slane %v48_v27, 4 }
  0x39   :  { %v50_v30 = vadd.f32 %v49_v29, %v48_v27 }
  0x3b   :  { %v51_v32 = vrot.slane %v50_v30, 2 }
  0x3d   :  { %v52_v33 = vadd.f32 %v51_v32, %v50_v30 }
  0x3f   :  { %v53_v35 = vrot.slane %v52_v33, 1 }
  0x41   :  { %v54_v36 = vadd.f32 %v53_v35, %v52_v33 }
  0x43   :  { %111 = vlog2.f32 %v54_v36 }
  0x4d   :  { %v112_v40 = vpop.eup %111 }
  0x4e   :  { %v56_v41 = vmul.f32 0.6931472, %v112_v40 }
  0x50   :  { %v57_v43 = vadd.f32 %v56_v41, %v39_v11 }
  0x52   :  { %v78_v44 = vsub.f32 %v77_v42, %v57_v43 }
  0x54   :  { %v79_v45 = vmul.f32 1.442695, %v78_v44 }
  0x56   :  { %113 = vpow2.f32 %v79_v45 }
  0x60   :  { %v114_v46 = vpop.eup %113 }
  0x61   :  { %v81_v47 = vsub.f32 1.0, %v114_v46 }
  0x63   :  { %v82_v48 = vmul.f32 %v81_v47, %v81_v47 }
  0x65   :  { %v83_v49 = vsub.f32 0.0, %v82_v48 }
  0x67   :  { %v84_v50 = vmul.f32 %v83_v49, %v78_v44 }
  0x69   :  { %86 = vst.msk [vmem:[#allocation5] sm:$0x1] %vm85_vm4, %v84_v50 }
  0x6a   :  { %148 = shalt.err (!%p145_p12)
}
  0x6b   :  { %s149_s29 = scalar_lea.hbm %s217_s2, 16 }
  0x6c   :  { %p150_p13 = scmp.ne.s32.totalorder %s217_s2, %s149_s29  ;;  %p153_p0 = scmp.lt.u32.totalorder %s149_s29, %s217_s2 }
  0x6e   :  { %p155_p1 = pnand %p153_p0, %p150_p13 }
  0x70   :  { %158 = shalt.err (!%p155_p1)
}
  0x71   :  { %96 = dma.vmem_to_hbm [thread:$0]  %s94_s24, 16, %s217_s2, [#allocation4]  }
  0x72   :  { %161 = dma.done.wait [#allocation4], 16  }
  0x73   :  { %162 = vsyncadd [#allocation4], 4294967280 }
  0x74   :  { %100 = vsyncpa [#allocation3], 1 }
  0x75   :  { %101 = vsyncpa [#allocation4], 1 }

</bundles_post_ra>
